<compile_context>
chip_gen: v5e
topology: v5e:2x2
jax: 0.10.0
libtpu: 0.0.40
codegen_flags: <defaults>
</compile_context>

<pallas_src>
import jax
import jax.numpy as jnp
from jax import lax
from jax.experimental import pallas as pl
from jax.experimental.pallas import tpu as pltpu

NEG_SLOPE = 0.2   # GraphLayer default negative_slope
BN_EPS = 1e-5     # nn.BatchNorm1d default eps
LANE = 128        # TPU lane width
MASK_NEG = -1e30


def graph_attn_kernel(x_ref, xt_ref, emb_ref, embt_ref, wt_ref,
                      ai_ref, aj_ref, aemi_ref, aemj_ref, bias_ref,
                      mask_ref, o_ref):
    f32 = jnp.float32

    # Source-side projection for ALL nodes (needed by every tile). Recomputed per
    # tile from small resident inputs: N*C_in*C MACs, ~1-2% of the main matmul.
    xw_all = jnp.dot(x_ref[...], wt_ref[...], preferred_element_type=f32)      # [N, C]
    emb_all = emb_ref[...]                                                     # [N, C]

    # Source attention logits as a single row [1, N] — MXU dot_generals, no XLU
    # lane reductions.
    gj = (lax.dot_general(aj_ref[...], xw_all, (((1,), (1,)), ((), ())),
                          preferred_element_type=f32)
          + lax.dot_general(aemj_ref[...], emb_all, (((1,), (1,)), ((), ())),
                            preferred_element_type=f32))                       # [1, N]

    # Destination attention logits for this tile's rows only: [T, 1].
    xw_t = jnp.dot(xt_ref[...], wt_ref[...], preferred_element_type=f32)       # [T, C]
    gi = (lax.dot_general(xw_t, ai_ref[...], (((1,), (1,)), ((), ())),
                          preferred_element_type=f32)
          + lax.dot_general(embt_ref[...], aemi_ref[...], (((1,), (1,)), ((), ())),
                            preferred_element_type=f32))                       # [T, 1]

    # Edge logits + LeakyReLU, then additive -1e30 mask (bf16 in HBM, widened).
    e = gi + gj                                                                # [T, N]
    e = jnp.where(e > 0, e, NEG_SLOPE * e)
    e = e + mask_ref[...].astype(f32)

    # Row softmax with deferred normalization. Every destination row has a self
    # loop, so the row max is finite and masked entries underflow to exactly 0:
    # no `* adj` multiply and no [T, N] divide needed.
    m = jnp.max(e, axis=-1, keepdims=True)                                     # [T, 1]
    p = jnp.exp(e - m)                                                         # [T, N]
    s = jnp.sum(p, axis=-1, keepdims=True)                                     # [T, 1]

    # Aggregate unnormalized, then scale by 1/rowsum (a [T, C] multiply).
    agg = jnp.dot(p, xw_all, preferred_element_type=f32)                       # [T, C]
    # approx=True (EUP vrcp) is cheaper but ~1e-3 accurate; keep exact for 1e-4 tol.
    inv = pl.reciprocal(s, approx=False)
    o_ref[...] = agg * inv + bias_ref[...]


def bn_relu_kernel(x_ref, gamma_ref, beta_ref, o_ref):
    xv = x_ref[...]
    mean = jnp.mean(xv, axis=0, keepdims=True)
    var = jnp.mean((xv - mean) ** 2, axis=0, keepdims=True)
    y = (xv - mean) * lax.rsqrt(var + BN_EPS)
    o_ref[...] = jnp.maximum(y * gamma_ref[...] + beta_ref[...], 0.0)


def build_adjacency(edge_index, num_nodes):
    """remove_self_loops + add_self_loops, as a dense [dst, src] 0/1 int32 mask."""
    src, dst = edge_index[0], edge_index[1]
    keep = (src != dst).astype(jnp.int32)
    adj = jnp.zeros((num_nodes, num_nodes), jnp.int32).at[dst, src].max(keep)
    idx = jnp.arange(num_nodes)
    return adj.at[idx, idx].set(1)


def _pick_tile(n, cap=256):
    """Largest destination tile (multiple of 16, bf16-safe sublanes) dividing n
    and giving >= 2 grid steps; fall back to a single full block."""
    for t in (cap, 128, 64, 32, 16):
        if t <= n // 2 and n % t == 0:
            return t
    return n


def gnn_layer_forward(x, edge_index, embedding, params):
    n, c_in = x.shape
    c_out = params["w"].shape[0]
    c_pad = max(LANE, ((c_out + LANE - 1) // LANE) * LANE)     # lane-dense features

    adj = build_adjacency(edge_index, n)
    # Additive mask: 0 for edges, -1e30 for non-edges; bf16 halves HBM bytes.
    mask = jnp.where(adj > 0, 0.0, MASK_NEG).astype(jnp.bfloat16)

    def pad_cols(a):
        return jnp.pad(a, ((0, 0), (0, c_pad - a.shape[-1])))

    w_t = pad_cols(params["w"].T)                              # [C_in, C_pad]
    emb_p = pad_cols(embedding)                                # [N, C_pad]
    ai, aj = pad_cols(params["att_i"]), pad_cols(params["att_j"])
    aemi, aemj = pad_cols(params["att_em_i"]), pad_cols(params["att_em_j"])
    bias_p = pad_cols(params["bias"])
    gamma_p, beta_p = pad_cols(params["gamma"]), pad_cols(params["beta"])

    tile = _pick_tile(n)
    nt = n // tile

    def full(shape):
        return pl.BlockSpec(shape, lambda i: (0, 0))

    def tiled(shape):
        return pl.BlockSpec(shape, lambda i: (i, 0))

    cost = pl.CostEstimate(
        flops=int(2 * n * n * c_pad + nt * (2 * n * c_in * c_pad + 4 * n * c_pad)
                  + 4 * n * n),
        transcendentals=int(n * n),
        bytes_accessed=int(2 * n * n + 4 * n * c_in + 4 * n * c_pad
                           + 4 * c_in * c_pad + 4 * n * c_pad),
    )

    out_raw = pl.pallas_call(
        graph_attn_kernel,
        out_shape=jax.ShapeDtypeStruct((n, c_pad), jnp.float32),
        grid=(nt,),
        in_specs=[
            full((n, c_in)),        # x, all source nodes (resident)
            tiled((tile, c_in)),    # x, this tile's destination rows
            full((n, c_pad)),       # embedding, all source nodes (resident)
            tiled((tile, c_pad)),   # embedding, destination rows
            full((c_in, c_pad)),    # W^T (padded output cols)
            full((1, c_pad)),       # att_i
            full((1, c_pad)),       # att_j
            full((1, c_pad)),       # att_em_i
            full((1, c_pad)),       # att_em_j
            full((1, c_pad)),       # bias
            tiled((tile, n)),       # additive bf16 mask rows (double-buffered)
        ],
        out_specs=tiled((tile, c_pad)),
        compiler_params=pltpu.CompilerParams(
            dimension_semantics=("parallel",),      # shard dst tiles across TCs
            vmem_limit_bytes=48 * 1024 * 1024),
        cost_estimate=cost,
    )(x, x, emb_p, emb_p, w_t, ai, aj, aemi, aemj, bias_p, mask)

    # BatchNorm (training-mode batch stats) + ReLU: cross-tile reduction over the
    # node axis, done in a second lightweight call on the small [N, C_pad] slab.
    out = pl.pallas_call(
        bn_relu_kernel,
        out_shape=jax.ShapeDtypeStruct((n, c_pad), jnp.float32),
        in_specs=[pl.BlockSpec(memory_space=pltpu.MemorySpace.VMEM)] * 3,
        out_specs=pl.BlockSpec(memory_space=pltpu.MemorySpace.VMEM),
    )(out_raw, gamma_p, beta_p)

    return out[:, :c_out]


def gnn_layer_reference(x, edge_index, embedding, params):
    """Pure-JAX reference of the same forward (for a correctness check)."""
    adj = build_adjacency(edge_index, x.shape[0]) > 0
    xw = x @ params["w"].T
    gi = xw @ params["att_i"].T + embedding @ params["att_em_i"].T       # [N, 1]
    gj = (xw @ params["att_j"].T + embedding @ params["att_em_j"].T).T   # [1, N]
    e = gi + gj
    e = jnp.where(e > 0, e, NEG_SLOPE * e)
    e = jnp.where(adj, e, MASK_NEG)
    p = jnp.exp(e - jnp.max(e, -1, keepdims=True))
    p = jnp.where(adj, p, 0.0)
    alpha = p / jnp.sum(p, -1, keepdims=True)
    out = alpha @ xw + params["bias"]
    mean = jnp.mean(out, 0, keepdims=True)
    var = jnp.mean((out - mean) ** 2, 0, keepdims=True)
    y = (out - mean) * lax.rsqrt(var + BN_EPS) * params["gamma"] + params["beta"]
    return jnp.maximum(y, 0.0)


if __name__ == "__main__":
    # Small shapes: node_num=32 nodes, in_channel=4, out_channel=32, heads=1.
    # (32 nodes so the destination-tile grid actually has 2 steps: tile=16.)
    N, C_IN, C_OUT = 32, 4, 32

    key = jax.random.PRNGKey(0)
    kx, ke, kw, k1, k2, k3, k4 = jax.random.split(key, 7)

    x = jax.random.normal(kx, (N, C_IN), jnp.float32)
    embedding = jax.random.normal(ke, (N, C_OUT), jnp.float32)

    # Deterministic synthetic graph: each node i receives from (i+1)%N and (i+3)%N,
    # plus one spurious self loop (0,0) to exercise remove_self_loops semantics.
    srcs, dsts = [], []
    for i in range(N):
        srcs += [(i + 1) % N, (i + 3) % N]
        dsts += [i, i]
    srcs.append(0)
    dsts.append(0)
    edge_index = jnp.array([srcs, dsts], dtype=jnp.int32)   # [2, 65]

    # Deterministic parameter init (glorot-ish scaling; bias zeroed like GDN).
    params = {
        "w": jax.random.normal(kw, (C_OUT, C_IN), jnp.float32) / jnp.sqrt(C_IN),
        "att_i": 0.1 * jax.random.normal(k1, (1, C_OUT), jnp.float32),
        "att_j": 0.1 * jax.random.normal(k2, (1, C_OUT), jnp.float32),
        "att_em_i": 0.1 * jax.random.normal(k3, (1, C_OUT), jnp.float32),
        "att_em_j": 0.1 * jax.random.normal(k4, (1, C_OUT), jnp.float32),
        "bias": jnp.zeros((1, C_OUT), jnp.float32),
        "gamma": jnp.ones((1, C_OUT), jnp.float32),   # BN weight
        "beta": jnp.zeros((1, C_OUT), jnp.float32),   # BN bias
    }

    out = jax.block_until_ready(gnn_layer_forward(x, edge_index, embedding, params))
    ref = jax.block_until_ready(gnn_layer_reference(x, edge_index, embedding, params))

    assert out.shape == (N, C_OUT)
    assert bool(jnp.all(jnp.isfinite(out)))
    assert bool(jnp.allclose(out, ref, atol=1e-4, rtol=1e-4))
    print("KERNEL_OK")
</pallas_src>

<mosaic_0001>
module attributes {stable_mosaic.version = 11 : i64} {
  func.func @graph_attn_kernel(%arg0: i32, %arg1: memref<32x4xf32, #tpu.memory_space<vmem>>, %arg2: memref<16x4xf32, #tpu.memory_space<vmem>>, %arg3: memref<32x128xf32, #tpu.memory_space<vmem>>, %arg4: memref<16x128xf32, #tpu.memory_space<vmem>>, %arg5: memref<4x128xf32, #tpu.memory_space<vmem>>, %arg6: memref<1x128xf32, #tpu.memory_space<vmem>>, %arg7: memref<1x128xf32, #tpu.memory_space<vmem>>, %arg8: memref<1x128xf32, #tpu.memory_space<vmem>>, %arg9: memref<1x128xf32, #tpu.memory_space<vmem>>, %arg10: memref<1x128xf32, #tpu.memory_space<vmem>>, %arg11: memref<16x32xbf16, #tpu.memory_space<vmem>>, %arg12: memref<16x128xf32, #tpu.memory_space<vmem>>) attributes {dimension_semantics = [#tpu.dimension_semantics<parallel>], iteration_bounds = array<i64: 2>, scalar_prefetch = 0 : i64, scratch_operands = 0 : i64, tpu.core_type = #tpu.core_type<tc>, window_params = [{pipeline_mode = #tpu.pipeline_mode<synchronous>, transform_indices = @transform_0, window_bounds = array<i64: 32, 4>}, {transform_indices = @transform_1, window_bounds = array<i64: 16, 4>}, {pipeline_mode = #tpu.pipeline_mode<synchronous>, transform_indices = @transform_2, window_bounds = array<i64: 32, 128>}, {transform_indices = @transform_3, window_bounds = array<i64: 16, 128>}, {pipeline_mode = #tpu.pipeline_mode<synchronous>, transform_indices = @transform_4, window_bounds = array<i64: 4, 128>}, {pipeline_mode = #tpu.pipeline_mode<synchronous>, transform_indices = @transform_5, window_bounds = array<i64: 1, 128>}, {pipeline_mode = #tpu.pipeline_mode<synchronous>, transform_indices = @transform_6, window_bounds = array<i64: 1, 128>}, {pipeline_mode = #tpu.pipeline_mode<synchronous>, transform_indices = @transform_7, window_bounds = array<i64: 1, 128>}, {pipeline_mode = #tpu.pipeline_mode<synchronous>, transform_indices = @transform_8, window_bounds = array<i64: 1, 128>}, {pipeline_mode = #tpu.pipeline_mode<synchronous>, transform_indices = @transform_9, window_bounds = array<i64: 1, 128>}, {transform_indices = @transform_10, window_bounds = array<i64: 16, 32>}, {transform_indices = @transform_11, window_bounds = array<i64: 16, 128>}]} {
    %c0 = arith.constant 0 : index
    %c0_0 = arith.constant 0 : index
    %0 = vector.load %arg1[%c0, %c0_0] : memref<32x4xf32, #tpu.memory_space<vmem>>, vector<32x4xf32>
    %c0_1 = arith.constant 0 : index
    %c0_2 = arith.constant 0 : index
    %1 = vector.load %arg5[%c0_1, %c0_2] : memref<4x128xf32, #tpu.memory_space<vmem>>, vector<4x128xf32>
    %cst = arith.constant dense<0.000000e+00> : vector<32x128xf32>
    %2 = tpu.matmul %0, %1, %cst {dimension_numbers = #tpu.dot_dimension_numbers<[1], [0], [0], [1], [0, 0, 1, 1], [], []>} : vector<32x4xf32>, vector<4x128xf32>, vector<32x128xf32> -> vector<32x128xf32>
    %c0_3 = arith.constant 0 : index
    %c0_4 = arith.constant 0 : index
    %3 = vector.load %arg3[%c0_3, %c0_4] : memref<32x128xf32, #tpu.memory_space<vmem>>, vector<32x128xf32>
    %c0_5 = arith.constant 0 : index
    %c0_6 = arith.constant 0 : index
    %4 = vector.load %arg7[%c0_5, %c0_6] : memref<1x128xf32, #tpu.memory_space<vmem>>, vector<1x128xf32>
    %cst_7 = arith.constant dense<0.000000e+00> : vector<1x32xf32>
    %5 = tpu.matmul %4, %2, %cst_7 {dimension_numbers = #tpu.dot_dimension_numbers<[1], [1], [0], [0], [0, 0, 1, 0], [], []>} : vector<1x128xf32>, vector<32x128xf32>, vector<1x32xf32> -> vector<1x32xf32>
    %c0_8 = arith.constant 0 : index
    %c0_9 = arith.constant 0 : index
    %6 = vector.load %arg9[%c0_8, %c0_9] : memref<1x128xf32, #tpu.memory_space<vmem>>, vector<1x128xf32>
    %cst_10 = arith.constant dense<0.000000e+00> : vector<1x32xf32>
    %7 = tpu.matmul %6, %3, %cst_10 {dimension_numbers = #tpu.dot_dimension_numbers<[1], [1], [0], [0], [0, 0, 1, 0], [], []>} : vector<1x128xf32>, vector<32x128xf32>, vector<1x32xf32> -> vector<1x32xf32>
    %8 = arith.addf %5, %7 : vector<1x32xf32>
    %c0_11 = arith.constant 0 : index
    %c0_12 = arith.constant 0 : index
    %9 = vector.load %arg2[%c0_11, %c0_12] : memref<16x4xf32, #tpu.memory_space<vmem>>, vector<16x4xf32>
    %c0_13 = arith.constant 0 : index
    %c0_14 = arith.constant 0 : index
    %10 = vector.load %arg5[%c0_13, %c0_14] : memref<4x128xf32, #tpu.memory_space<vmem>>, vector<4x128xf32>
    %cst_15 = arith.constant dense<0.000000e+00> : vector<16x128xf32>
    %11 = tpu.matmul %9, %10, %cst_15 {dimension_numbers = #tpu.dot_dimension_numbers<[1], [0], [0], [1], [0, 0, 1, 1], [], []>} : vector<16x4xf32>, vector<4x128xf32>, vector<16x128xf32> -> vector<16x128xf32>
    %c0_16 = arith.constant 0 : index
    %c0_17 = arith.constant 0 : index
    %12 = vector.load %arg6[%c0_16, %c0_17] : memref<1x128xf32, #tpu.memory_space<vmem>>, vector<1x128xf32>
    %cst_18 = arith.constant dense<0.000000e+00> : vector<16x1xf32>
    %13 = tpu.matmul %11, %12, %cst_18 {dimension_numbers = #tpu.dot_dimension_numbers<[1], [1], [0], [0], [0, 0, 1, 0], [], []>} : vector<16x128xf32>, vector<1x128xf32>, vector<16x1xf32> -> vector<16x1xf32>
    %c0_19 = arith.constant 0 : index
    %c0_20 = arith.constant 0 : index
    %14 = vector.load %arg4[%c0_19, %c0_20] : memref<16x128xf32, #tpu.memory_space<vmem>>, vector<16x128xf32>
    %c0_21 = arith.constant 0 : index
    %c0_22 = arith.constant 0 : index
    %15 = vector.load %arg8[%c0_21, %c0_22] : memref<1x128xf32, #tpu.memory_space<vmem>>, vector<1x128xf32>
    %cst_23 = arith.constant dense<0.000000e+00> : vector<16x1xf32>
    %16 = tpu.matmul %14, %15, %cst_23 {dimension_numbers = #tpu.dot_dimension_numbers<[1], [1], [0], [0], [0, 0, 1, 0], [], []>} : vector<16x128xf32>, vector<1x128xf32>, vector<16x1xf32> -> vector<16x1xf32>
    %17 = arith.addf %13, %16 : vector<16x1xf32>
    %18 = vector.broadcast %17 : vector<16x1xf32> to vector<16x32xf32>
    %19 = vector.broadcast %8 : vector<1x32xf32> to vector<16x32xf32>
    %20 = arith.addf %18, %19 : vector<16x32xf32>
    %cst_24 = arith.constant 0.000000e+00 : f32
    %21 = vector.broadcast %cst_24 : f32 to vector<16x32xf32>
    %22 = arith.cmpf ogt, %20, %21 : vector<16x32xf32>
    %cst_25 = arith.constant 2.000000e-01 : f32
    %23 = vector.broadcast %cst_25 : f32 to vector<16x32xf32>
    %24 = arith.mulf %23, %20 : vector<16x32xf32>
    %25 = arith.select %22, %20, %24 : vector<16x32xi1>, vector<16x32xf32>
    %c0_26 = arith.constant 0 : index
    %c0_27 = arith.constant 0 : index
    %26 = vector.load %arg11[%c0_26, %c0_27] : memref<16x32xbf16, #tpu.memory_space<vmem>>, vector<16x32xbf16>
    %27 = arith.extf %26 : vector<16x32xbf16> to vector<16x32xf32>
    %28 = arith.addf %25, %27 : vector<16x32xf32>
    %cst_28 = arith.constant dense<0xFF800000> : vector<16xf32>
    %29 = vector.multi_reduction <maximumf>, %28, %cst_28 [1] : vector<16x32xf32> to vector<16xf32>
    %30 = vector.shape_cast %29 : vector<16xf32> to vector<16x1xf32>
    %31 = vector.broadcast %30 : vector<16x1xf32> to vector<16x32xf32>
    %32 = arith.subf %28, %31 : vector<16x32xf32>
    %33 = math.exp %32 : vector<16x32xf32>
    %cst_29 = arith.constant dense<0.000000e+00> : vector<16xf32>
    %34 = vector.multi_reduction <add>, %33, %cst_29 [1] : vector<16x32xf32> to vector<16xf32>
    %35 = vector.shape_cast %34 : vector<16xf32> to vector<16x1xf32>
    %cst_30 = arith.constant dense<0.000000e+00> : vector<16x128xf32>
    %36 = tpu.matmul %33, %2, %cst_30 {dimension_numbers = #tpu.dot_dimension_numbers<[1], [0], [0], [1], [0, 0, 1, 1], [], []>} : vector<16x32xf32>, vector<32x128xf32>, vector<16x128xf32> -> vector<16x128xf32>
    %37 = tpu.reciprocal %35 : vector<16x1xf32> -> vector<16x1xf32>
    %38 = vector.broadcast %37 : vector<16x1xf32> to vector<16x128xf32>
    %39 = arith.mulf %36, %38 : vector<16x128xf32>
    %c0_31 = arith.constant 0 : index
    %c0_32 = arith.constant 0 : index
    %40 = vector.load %arg10[%c0_31, %c0_32] : memref<1x128xf32, #tpu.memory_space<vmem>>, vector<1x128xf32>
    %41 = vector.broadcast %40 : vector<1x128xf32> to vector<16x128xf32>
    %42 = arith.addf %39, %41 : vector<16x128xf32>
    %c0_33 = arith.constant 0 : index
    %c0_34 = arith.constant 0 : index
    %43 = vector.load %arg12[%c0_33, %c0_34] : memref<16x128xf32, #tpu.memory_space<vmem>>, vector<16x128xf32>
    tpu.vector_store %arg12[%c0_33, %c0_34], %42 {strides = array<i32>} : memref<16x128xf32, #tpu.memory_space<vmem>>, vector<16x128xf32>,
    return
  }
  func.func @transform_0(%arg0: i32) -> (i32, i32) {
    %c0_i32 = arith.constant 0 : i32
    %c0_i32_0 = arith.constant 0 : i32
    %c0_i32_1 = arith.constant 0 : i32
    return %c0_i32, %c0_i32_0 : i32, i32
  }
  func.func @transform_1(%arg0: i32) -> (i32, i32) {
    %c0_i32 = arith.constant 0 : i32
    %c0_i32_0 = arith.constant 0 : i32
    return %arg0, %c0_i32 : i32, i32
  }
  func.func @transform_2(%arg0: i32) -> (i32, i32) {
    %c0_i32 = arith.constant 0 : i32
    %c0_i32_0 = arith.constant 0 : i32
    %c0_i32_1 = arith.constant 0 : i32
    return %c0_i32, %c0_i32_0 : i32, i32
  }
  func.func @transform_3(%arg0: i32) -> (i32, i32) {
    %c0_i32 = arith.constant 0 : i32
    %c0_i32_0 = arith.constant 0 : i32
    return %arg0, %c0_i32 : i32, i32
  }
  func.func @transform_4(%arg0: i32) -> (i32, i32) {
    %c0_i32 = arith.constant 0 : i32
    %c0_i32_0 = arith.constant 0 : i32
    %c0_i32_1 = arith.constant 0 : i32
    return %c0_i32, %c0_i32_0 : i32, i32
  }
  func.func @transform_5(%arg0: i32) -> (i32, i32) {
    %c0_i32 = arith.constant 0 : i32
    %c0_i32_0 = arith.constant 0 : i32
    %c0_i32_1 = arith.constant 0 : i32
    return %c0_i32, %c0_i32_0 : i32, i32
  }
  func.func @transform_6(%arg0: i32) -> (i32, i32) {
    %c0_i32 = arith.constant 0 : i32
    %c0_i32_0 = arith.constant 0 : i32
    %c0_i32_1 = arith.constant 0 : i32
    return %c0_i32, %c0_i32_0 : i32, i32
  }
  func.func @transform_7(%arg0: i32) -> (i32, i32) {
    %c0_i32 = arith.constant 0 : i32
    %c0_i32_0 = arith.constant 0 : i32
    %c0_i32_1 = arith.constant 0 : i32
    return %c0_i32, %c0_i32_0 : i32, i32
  }
  func.func @transform_8(%arg0: i32) -> (i32, i32) {
    %c0_i32 = arith.constant 0 : i32
    %c0_i32_0 = arith.constant 0 : i32
    %c0_i32_1 = arith.constant 0 : i32
    return %c0_i32, %c0_i32_0 : i32, i32
  }
  func.func @transform_9(%arg0: i32) -> (i32, i32) {
    %c0_i32 = arith.constant 0 : i32
    %c0_i32_0 = arith.constant 0 : i32
    %c0_i32_1 = arith.constant 0 : i32
    return %c0_i32, %c0_i32_0 : i32, i32
  }
  func.func @transform_10(%arg0: i32) -> (i32, i32) {
    %c0_i32 = arith.constant 0 : i32
    %c0_i32_0 = arith.constant 0 : i32
    return %arg0, %c0_i32 : i32, i32
  }
  func.func @transform_11(%arg0: i32) -> (i32, i32) {
    %c0_i32 = arith.constant 0 : i32
    %c0_i32_0 = arith.constant 0 : i32
    return %arg0, %c0_i32 : i32, i32
  }
}

</mosaic_0001>

<bundles_post_ra>
// kernel: tpu_custom_call.1
= control target key start
LH: loop header
LB: loop body
LE: loop exit
PB: predicated region body
PF: predicated region fallthrough
CT: control target
= control target key end

     0   :  { %s1614_s0 = inlined_call_operand.vmem [shape: f32[32,4], index: 0, kind: input, shape index: {}]   ;;  %s1615_s1 = inlined_call_operand.vmem [shape: f32[32,4], index: 1, kind: input, shape index: {}]   ;;  %s1616_s2 = inlined_call_operand.vmem [shape: f32[32,128], index: 2, kind: input, shape index: {}]   ;;  %s1617_s3 = inlined_call_operand.vmem [shape: f32[32,128], index: 3, kind: input, shape index: {}]   ;;  %s1618_s4 = inlined_call_operand.hbm [shape: f32[4,128], index: 4, kind: input, shape index: {}]   ;;  %s1619_s5 = inlined_call_operand.hbm [shape: f32[1,128], index: 5, kind: input, shape index: {}]   ;;  %s1620_s6 = inlined_call_operand.hbm [shape: f32[1,128], index: 6, kind: input, shape index: {}]   ;;  %s1621_s7 = inlined_call_operand.hbm [shape: f32[1,128], index: 7, kind: input, shape index: {}]   ;;  %s1622_s8 = inlined_call_operand.hbm [shape: f32[1,128], index: 8, kind: input, shape index: {}]   ;;  %s1623_s9 = inlined_call_operand.hbm [shape: f32[1,128], index: 9, kind: input, shape index: {}]   ;;  %s1624_s10 = inlined_call_operand.vmem [shape: bf16[32,32], index: 10, kind: input, shape index: {}]   ;;  %s1625_s11 = inlined_call_operand.hbm [shape: f32[32,128], index: 11, kind: output, shape index: {}]  }
   0x1   :  { %1629 = sst [smem:[#allocation22_spill]] %s1619_s5 }
   0x2   :  { %1630 = sst [smem:[#allocation23_spill]] %s1621_s7 }
   0x3   :  { %16 = vsyncpa [#allocation3], 0 }
   0x4   :  { %17 = vsyncpa [#allocation6], 0 }
   0x5   :  { %18 = vsyncpa [#allocation9], 0 }
   0x6   :  { %19 = vsyncpa [#allocation12], 0 }
   0x7   :  { %20 = vsyncpa [#allocation4], 0 }
   0x8   :  { %22 = vsyncpa [#allocation4 + $0x1], 0  ;;  %s1419_s17 = smov 0   ;;  %s1421_s18 = smov 0  }
   0x9   :  { %s1423_s19 = smov 0   ;;  %s1425_s20 = smov 0  }
   0xa LB: > { %1631 = sst [smem:[#allocation19_spill]] %s1345_s19  ;;  %s1440_s21 = sadd.s32 4294967295, %s1349_s20   ;;  %s1349_s20 = sphi %s1425_s20, %s1640_s20   ;;  %s1345_s19 = sphi %s1423_s19, %s1642_s19   ;;  %s1341_s18 = sphi %s1421_s18, %s1644_s18   ;;  %s1337_s17 = sphi %s1419_s17, %s1643_s17  }
   0xb   : > { %s935_s22 = sadd.s32 4294967294, %s1349_s20   ;;  %s1444_s23 = sadd.s32 1, %s1349_s20  }
   0xc   : > { %1632 = sst [smem:[#allocation20_spill]] %s1444_s23  ;;  %s281_s24 = sadd.s32 1, %s1345_s19 }
   0xd   : > { %s278_s25 = ssub.s32 %s1349_s20, %s1444_s23  ;;  %p291_p0 = scmp.ne.s32.totalorder %s1345_s19, %s1341_s18 }
   0xe   : > { %p279_p1 = scmp.eq.s32.totalorder %s278_s25, 0  ;;  %p292_p2 = scmp.eq.s32.totalorder %s1440_s21, 1 }
   0xf   : > { %p297_p3 = scmp.ne.s32.totalorder %s1341_s18, %s1337_s17  ;;  %p298_p4 = scmp.eq.s32.totalorder %s935_s22, 1 }
  0x10   : > { %s1455_s26 = scalar_select %p279_p1, %s1345_s19, %s281_s24  }
  0x11   : > { %p1457_p5 = por %p292_p2, %p291_p0  ;;  %p1461_p6 = por %p298_p4, %p297_p3 }
  0x12   : > { %1633 = sst [smem:[#allocation21_spill]] %s1455_s26  ;;  %p936_p7 = scmp.ge.s32.totalorder %s1349_s20, 1 }
  0x13   : > { %p305_p8 = scmp.lt.s32.totalorder %s1349_s20, 3  ;;  %p1027_p9 = scmp.eq.s32.totalorder %s1440_s21, 0 }
  0x14   : > { %s1637_s5 = sld [smem:[#allocation22_spill]]  ;;  %s1351_s14 = smov [#allocation5]  }
  0x15   : > { %p1468_p10 = pnand %p936_p7, %p305_p8  ;;  %s337_s15 = sshll.u32 %s1351_s14, 4  ;;  %s338_s15 = int_to_ptr.vmem [resolvable:$true] %s337_s15 }
  0x16   : > { %s1638_s7 = sld [smem:[#allocation23_spill]]  ;;  %s1352_s26 = smov [#allocation8]  }
  0x17   : > { %p1004_p11 = pneg %p1468_p10  ;;  %s361_s14 = sshll.u32 %s1352_s26, 4  ;;  %s362_s14 = int_to_ptr.vmem [resolvable:$true] %s361_s14 }
  0x18   : > { %s1353_s19 = smov [#allocation2]   ;;  %s1354_s26 = smov [#allocation7]  }
  0x19   : > { %p1482_p12 = pnand %p1027_p9, %p1004_p11  ;;  %s325_s23 = sshll.u32 %s1353_s19, 4  ;;  %s326_s23 = int_to_ptr.vmem [resolvable:$true] %s325_s23 }
  0x1a   : > { %s335_s13 = sshll.u32 %s1637_s5, 4  ;;  %s323_s5 = sshll.u32 %s1618_s4, 4  ;;  %s336_s13 = int_to_ptr.hbm [resolvable:$true] %s335_s13  ;;  %s324_s5 = int_to_ptr.hbm [resolvable:$true] %s323_s5 }
  0x1b   : > { %1010 = dma.hbm_to_vmem [thread:$0]  (!%p1482_p12), %s336_s13, 16, %s338_s15, [#allocation6]  }
  0x1c   : > { %s359_s24 = sshll.u32 %s1638_s7, 4  ;;  %s347_s7 = sshll.u32 %s1620_s6, 4  ;;  %s360_s24 = int_to_ptr.hbm [resolvable:$true] %s359_s24  ;;  %s348_s7 = int_to_ptr.hbm [resolvable:$true] %s347_s7 }
  0x1d   : > { %1016 = dma.hbm_to_vmem [thread:$0]  (!%p1482_p12), %s360_s24, 16, %s362_s14, [#allocation9]  }
  0x1e   : > { %1007 = dma.hbm_to_vmem [thread:$0]  (!%p1482_p12), %s324_s5, 64, %s326_s23, [#allocation3]  }
  0x1f   : > { %s349_s30 = sshll.u32 %s1354_s26, 4  ;;  %s371_s15 = sshll.u32 %s1622_s8, 4  ;;  %s350_s30 = int_to_ptr.vmem [resolvable:$true] %s349_s30  ;;  %s372_s15 = int_to_ptr.hbm [resolvable:$true] %s371_s15 }
  0x20   : > { %1013 = dma.hbm_to_vmem [thread:$0]  (!%p1482_p12), %s348_s7, 16, %s350_s30, [#allocation6]  }
  0x21   : > { %s383_s16 = sshll.u32 %s1623_s9, 4  ;;  %s1355_s19 = smov [#allocation10]   ;;  %s384_s16 = int_to_ptr.hbm [resolvable:$true] %s383_s16 }
  0x22   : > { %s373_s22 = sshll.u32 %s1355_s19, 4  ;;  %s1356_s5 = smov [#allocation11]   ;;  %s374_s22 = int_to_ptr.vmem [resolvable:$true] %s373_s22 }
  0x23   : > { %1019 = dma.hbm_to_vmem [thread:$0]  (!%p1482_p12), %s372_s15, 16, %s374_s22, [#allocation9]  }
  0x24   : > { %s385_s23 = sshll.u32 %s1356_s5, 4  ;;  %425 = sbr.rel (%p1468_p10) target bundleno = 637 (0x27d), region = 64  ;;  %s386_s23 = int_to_ptr.vmem [resolvable:$true] %s385_s23 }
  0x25   : > { %1022 = dma.hbm_to_vmem [thread:$0]  (!%p1482_p12), %s384_s16, 16, %s386_s23, [#allocation12]  }
  0x29   : > { %1316 = dma.done.wait (%p1027_p9), [#allocation3], 64  }
  0x2a   : > { %1318 = vsyncadd (%p1027_p9), [#allocation3], 4294967232 }
  0x2b   : > { %1320 = dma.done.wait (%p1027_p9), [#allocation6], 32  }
  0x2c   : > { %1322 = vsyncadd (%p1027_p9), [#allocation6], 4294967264 }
  0x2d   : > { %1324 = dma.done.wait (%p1027_p9), [#allocation9], 32  }
  0x2e   : > { %1326 = vsyncadd (%p1027_p9), [#allocation9], 4294967264 }
  0x2f   : > { %1328 = dma.done.wait (%p1027_p9), [#allocation12], 16  }
  0x30   : > { %1330 = vsyncadd (%p1027_p9), [#allocation12], 4294967280  ;;  %s952_s7 = sshll.u32 %s1440_s21, 1  ;;  %vm538_vm0 = vcmask 1043456   ;;  %vm525_vm1 = vcmask 31744   ;;  %v520_v1 = vld [vmem:[%s1614_s0] sm:$0xff] }
  0x31   : > { %p502_p13 = scmp.lt.s32.totalorder %s952_s7, 3  ;;  %v524_v0 = vld [vmem:[#allocation2] sm:$0xf]  ;;  %v521_v3 = vld [vmem:[%s1614_s0 + $0x8] sm:$0xff]  ;;  %v523_v6 = vld [vmem:[%s1614_s0 + $0x18] sm:$0xff]  ;;  %vm687_vm3 = vcmask 261120  }
  0x32   : > { %958 = vmatpush.msk.msra.mxu0 %vm538_vm0, %v524_v0  ;;  %963 = vmatpush.msk.msra.mxu3 %vm538_vm0, %v524_v0  ;;  %v522_v5 = vld [vmem:[%s1614_s0 + $0x10] sm:$0xff]  ;;  %v574_v7 = vld [vmem:[%s1616_s2 + $0x18] sm:$0xff]  ;;  %v572_v10 = vld [vmem:[%s1616_s2 + $0x8] sm:$0xff]  ;;  %s973_s25 = sshll.u32 %s1440_s21, 4  ;;  %s1291_s22 = scalar_lea.hbm %s1625_s11, 32 }
  0x33   : > { %s1646_s7 = smov (!%p502_p13, %s952_s7), 3  ;;  %959 = vmatmul.msk.f32.vlgmr.msra.gmra.mxu0 %vm525_vm1, %v520_v1  ;;  %589 = vmatpush.xpose.msra.mxu1 %v574_v7  ;;  %v573_v9 = vld [vmem:[%s1616_s2 + $0x10] sm:$0xff]  ;;  %v1080_v11 = vld [vmem:[#allocation8] ss:$0 sm:$0xff]  ;;  %v571_v15 = vld [vmem:[%s1616_s2] sm:$0xff]  ;;  %s785_s12 = scalar_lea.hbm %s1625_s11, %s973_s25 }
  0x34   : > { %s953_s29 = sshll.u32 %s1646_s7, 3  ;;  %v576_v18 = vld [vmem:[#allocation10] sm:$0x1]  ;;  %v1081_v19 = vld [vmem:[#allocation5] ss:$0 sm:$0xff]  ;;  %s788_s21 = sshll.u32 %s785_s12, 4  ;;  %s789_s21 = int_to_ptr.hbm [resolvable:$true] %s788_s21 }
  0x35   : > { %s505_s30 = scalar_lea.vmem %s1615_s1, %s953_s29  ;;  %s511_s13 = scalar_lea.vmem %s1617_s3, %s953_s29  ;;  %v575_v26 = vld [vmem:[#allocation7] sm:$0x1] }
  0x36   : > { %v617_v2 = vld [vmem:[%s505_s30] sm:$0xff]  ;;  %v618_v4 = vld [vmem:[%s505_s30 + $0x8] sm:$0xff]  ;;  %s957_s29 = sshll.u32 %s1646_s7, 2  ;;  %s498_s7 = sand.u32 1, %s1341_s18  }
  0x37   : > { %964 = vmatmul.msk.f32.vlgmr.msra.gmra.mxu3 %vm525_vm1, %v617_v2  ;;  %590 = vmatpush.xpose.msra.mxu1 %v573_v9  ;;  %v649_v12 = vld [vmem:[%s511_s13] sm:$0xff]  ;;  %v650_v17 = vld [vmem:[%s511_s13 + $0x8] sm:$0xff]  ;;  %s517_s5 = scalar_lea.vmem %s1624_s10, %s957_s29  ;;  %s951_s23 = sshll.u32 %s498_s7, 4 }
  0x38   : > { %v655_v14 = vmul.f32 %v1080_v11, %v649_v12  ;;  %v656_v20 = vmul.f32 %v1080_v11, %v650_v17  ;;  %v975_v37 = vld [vmem:[%s517_s5] sm:$0xff]   ;;  %s500_s13 = scalar_lea.vmem [#allocation13], %s951_s23  ;;  %s774_s24 = scalar_lea.sflag [#allocation4], %s498_s7 }
  0x39   : > { %v976_v40 = vunpack.c.l.bf16 %v975_v37  ;;  %v977_v46 = vunpack.c.h.bf16 %v975_v37  ;;  %s786_s15 = sshll.u32 %s500_s13, 4  ;;  %s1285_s14 = sshra.s32 %s789_s21, 4  ;;  %s787_s15 = int_to_ptr.vmem [resolvable:$true] %s786_s15  ;;  %s1286_s14 = int_to_ptr.hbm [resolvable:$true] %s1285_s14 }
  0x3a   : > { %657 = vadd.xlane.f32.xlu0 %v655_v14  ;;  %659 = vadd.xlane.f32.xlu1 %v656_v20  ;;  %s1287_s16 = scalar_lea.hbm %s1286_s14, 16  ;;  %p1292_p3 = scmp.lt.s32.totalorder %s1286_s14, %s1625_s11 }
  0x3b   : > { %960 = vmatmul.msk.f32.gmra.mxu0 %vm525_vm1, %v521_v3  ;;  %591 = vmatpush.xpose.msra.mxu1 %v572_v10  ;;  %v1082_v10 = vld [vmem:[#allocation11] ss:$0 sm:$0xff]  ;;  %p1288_p0 = scmp.ne.s32.totalorder %s1286_s14, %s1287_s16  ;;  %p1293_p4 = scmp.lt.s32.totalorder %s1291_s22, %s1287_s16 }
  0x3d   : > { %p1289_p1 = pnand %p1288_p0, %p1457_p5  ;;  %p1294_p7 = por %p1293_p4, %p1292_p3 }
  0x3f   : > { %965 = vmatmul.msk.f32.gmra.mxu3 %vm525_vm1, %v618_v4  ;;  %592 = vmatpush.xpose.msra.mxu1 %v571_v15  ;;  %p1290_p2 = pneg %p1289_p1 }
  0x41   : > { %p1295_p8 = pnand %p1294_p7, %p1290_p2 }
  0x42   : > { %593 = vmatmul.f32.vlgmr.msra.gmra.mxu1 %v576_v18 }
  0x43   : > { %961 = vmatmul.msk.f32.gmra.mxu0 %vm525_vm1, %v522_v5 }
  0x4b   : > { %962 = vmatmul.msk.f32.gmra.mxu0 %vm525_vm1, %v523_v6 }
  0xad   : > { %v660_v27 = vpop.xlane.xlu1 %659  ;;  %v658_v28 = vpop.xlane.xlu0 %657 }
  0xb0   : > { %v559_v8 = vpop.f32.mrf.mxu0 }
  0xb8   : > { %v562_v13 = vpop.f32.mrf.mxu0 }
  0xba   : > { %v642_v16 = vpop.f32.mrf.mxu3 }
  0xbb   : > { %v664_v21 = vmul.f32 %v1081_v19, %v642_v16 }
  0xbd   : > { %666 = vadd.xlane.f32.xlu0 %v664_v21 }
  0xbf   : > { %v594_v29 = vpop.f32.mrf.mxu1 }
  0xc0   : > { %v565_v22 = vpop.f32.mrf.mxu0 }
  0xc2   : > { %v645_v23 = vpop.f32.mrf.mxu3 }
  0xc3   : > { %v665_v24 = vmul.f32 %v1081_v19, %v645_v23 }
  0xc5   : > { %669 = vadd.xlane.f32.xlu1 %v665_v24 }
  0xc8   : > { %v568_v25 = vpop.f32.mrf.mxu0 }
  0xc9   : > { %609 = vmatpush.xpose.msra.mxu2 %v568_v25  ;;  %724 = vmatpush.msrb.mxu3 %v568_v25 }
  0xcb   : > { %725 = vmatpush.msrb.mxu3 %v565_v22 }
  0xcd   : > { %610 = vmatpush.xpose.msra.mxu2 %v565_v22  ;;  %726 = vmatpush.msrb.mxu3 %v562_v13 }
  0xcf   : > { %727 = vmatpush.msrb.mxu3 %v559_v8 }
  0xd1   : > { %611 = vmatpush.xpose.msra.mxu2 %v562_v13 }
  0xd5   : > { %612 = vmatpush.xpose.msra.mxu2 %v559_v8 }
  0xd8   : > { %613 = vmatmul.f32.vlgmr.msra.gmra.mxu2 %v575_v26 }
 0x130   : > { %v667_v31 = vpop.xlane.xlu0 %666 }
 0x131   : > { %v668_v35 = vadd.f32 %v667_v31, %v658_v28 }
 0x138   : > { %v670_v30 = vpop.xlane.xlu1 %669 }
 0x139   : > { %v671_v34 = vadd.f32 %v670_v30, %v660_v27 }
 0x15b   : > { %v614_v32 = vpop.f32.mrf.mxu2 }
 0x15c   : > { %v615_v33 = vadd.f32 %v614_v32, %v594_v29 }
 0x15e   : > { %v672_v36 = vperm.slane %v615_v33, 0 }
 0x160   : > { %v673_v38 = vadd.f32 %v672_v36, %v668_v35  ;;  %v674_v39 = vadd.f32 %v672_v36, %v671_v34 }
 0x162   : > { %vm675_vm2 = vcmp.gt.f32.partialorder %v673_v38, 0.0  ;;  %v677_v41 = vmul.f32 0.2, %v673_v38  ;;  %v678_v42 = vmul.f32 0.2, %v674_v39  ;;  %vm676_vm4 = vcmp.gt.f32.partialorder %v674_v39, 0.0 }
 0x164   : > { %v679_v43 = vsel %vm675_vm2, %v673_v38, %v677_v41  ;;  %v680_v47 = vsel %vm676_vm4, %v674_v39, %v678_v42 }
 0x165   : > { %v685_v44 = vadd.f32 %v976_v40, %v679_v43  ;;  %v686_v48 = vadd.f32 %v977_v46, %v680_v47 }
 0x167   : > { %v688_v45 = vsel %vm687_vm3, %v685_v44, -inf  ;;  %v691_v49 = vsel %vm687_vm3, %v686_v48, -inf }
 0x168   : > { %689 = vmax.xlane.f32.xlu2 %v688_v45 }
 0x170   : > { %692 = vmax.xlane.f32.xlu2 %v691_v49 }
 0x1db   : > { %v690_v50 = vpop.xlane.xlu2 %689 }
 0x1dc   : > { %v694_v51 = vsub.f32 %v685_v44, %v690_v50 }
 0x1de   : > { %v696_v52 = vmul.f32 1.442695, %v694_v51 }
 0x1e0   : > { %1083 = vpow2.f32 %v696_v52 }
 0x1e3   : > { %v693_v53 = vpop.xlane.xlu2 %692 }
 0x1e4   : > { %v695_v54 = vsub.f32 %v686_v48, %v693_v53 }
 0x1e6   : > { %v1084_v55 = vpop.eup %1083  ;;  %v698_v56 = vmul.f32 1.442695, %v695_v54 }
 0x1e7   : > { %966 = vmatmul.msk.f32.vlgmr.msrb.gmra.mxu3 %vm687_vm3, %v1084_v55  ;;  %v700_v57 = vsel %vm687_vm3, %v1084_v55, 0.0 }
 0x1e8   : > { %1085 = vpow2.f32 %v698_v56  ;;  %701 = vadd.xlane.f32.xlu0 %v700_v57 }
 0x1ee   : > { %v1086_v58 = vpop.eup %1085 }
 0x1ef   : > { %967 = vmatmul.msk.f32.gmra.mxu3 %vm687_vm3, %v1086_v58  ;;  %v703_v59 = vsel %vm687_vm3, %v1086_v58, 0.0 }
 0x1f0   : > { %704 = vadd.xlane.f32.xlu1 %v703_v59 }
 0x25b   : > { %v702_v60 = vpop.xlane.xlu0 %701 }
 0x25c   : > { %1087 = vrcp.f32 %v702_v60  ;;  %v746_v1 = vand.u32 2147483648, %v702_v60  ;;  %v744_v3 = vand.u32 2147483647, %v702_v60  ;;  %vm740_vm6 = vweird.f32 %v702_v60 }
 0x25e   : > { %v747_v7 = vor.u32 1.1754944e-38, %v746_v1  ;;  %vm745_vm8 = vcmp.eq.f32.partialorder %v744_v3, 8.507059e+37 }
 0x262   : > { %v1088_v61 = vpop.eup %1087 }
 0x263   : > { %v736_v62 = vmul.f32 %v1088_v61, %v702_v60  ;;  %v705_v63 = vpop.xlane.xlu1 %704  ;;  %vm741_vm5 = vweird.f32 %v1088_v61 }
 0x264   : > { %1089 = vrcp.f32 %v705_v63  ;;  %vm742_vm7 = vmor %vm740_vm6, %vm741_vm5  ;;  %v760_v14 = vand.u32 2147483648, %v705_v63  ;;  %v758_v17 = vand.u32 2147483647, %v705_v63  ;;  %vm754_vm10 = vweird.f32 %v705_v63 }
 0x265   : > { %v737_v0 = vsub.f32 1.0, %v736_v62 }
 0x266   : > { %v761_v19 = vor.u32 1.1754944e-38, %v760_v14  ;;  %vm759_vm12 = vcmp.eq.f32.partialorder %v758_v17, 8.507059e+37 }
 0x267   : > { %v738_v2 = vmul.f32 %v1088_v61, %v737_v0 }
 0x269   : > { %v739_v4 = vadd.f32 %v1088_v61, %v738_v2 }
 0x26a   : > { %v1090_v5 = vpop.eup %1089  ;;  %v729_v6 = vpop.f32.mrf.mxu3 }
 0x26b   : > { %v750_v8 = vmul.f32 %v1090_v5, %v705_v63  ;;  %v743_v9 = vsel %vm742_vm7, %v1088_v61, %v739_v4  ;;  %vm755_vm9 = vweird.f32 %v1090_v5 }
 0x26c   : > { %v748_v11 = vsel %vm745_vm8, %v747_v7, %v743_v9  ;;  %vm756_vm11 = vmor %vm754_vm10, %vm755_vm9 }
 0x26d   : > { %v751_v12 = vsub.f32 1.0, %v750_v8  ;;  %v763_v13 = vmul.f32 %v748_v11, %v729_v6 }
 0x26f   : > { %v752_v15 = vmul.f32 %v1090_v5, %v751_v12  ;;  %v769_v16 = vadd.f32 %v1082_v10, %v763_v13 }
 0x271   : > { %771 = vst [vmem:[%s500_s13] sm:$0xff] %v769_v16  ;;  %v753_v18 = vadd.f32 %v1090_v5, %v752_v15 }
 0x272   : > { %v732_v21 = vpop.f32.mrf.mxu3 }
 0x273   : > { %v757_v20 = vsel %vm756_vm11, %v1090_v5, %v753_v18 }
 0x274   : > { %v762_v22 = vsel %vm759_vm12, %v761_v19, %v757_v20 }
 0x275   : > { %v764_v23 = vmul.f32 %v762_v22, %v732_v21 }
 0x277   : > { %v770_v24 = vadd.f32 %v1082_v10, %v764_v23 }
 0x279   : > { %772 = vst [vmem:[%s500_s13 + $0x8] sm:$0xff] %v770_v24 }
 0x27a   : > { %1298 = shalt.err (!%p1295_p8)
}
 0x27b   : > { %s1357_s7 = smov 128   ;;  %s1358_s25 = smov 8  }
 0x27c   : > { %1002 = dma.vmem_to_hbm [thread:$0]  (%p1457_p5), %s787_s15, 256, %s789_s21, %s774_s24, %s1357_s7, %s1357_s7, %s1358_s25  }
 0x27d PF: > { %p1039_p9 = scmp.ge.s32.totalorder %s1349_s20, 2  ;;  %s803_s26 = sand.u32 1, %s1337_s17  }
 0x27e   : > { %s804_s30 = scalar_lea.sflag [#allocation4], %s803_s26 }
 0x27f   : > { %p1024_p10 = pnand %p1039_p9, %p1461_p6 }
 0x281   : > { %p1025_p11 = pneg %p1024_p10 }
 0x283   : > { %1332 = dma.done.wait (%p1025_p11), %s804_s30, 256  }
 0x284   : > { %1334 = vsyncadd (%p1025_p11), %s804_s30, 4294967040  ;;  %s1640_s20 = sld [smem:[#allocation20_spill]]  ;;  %s1643_s17 = smov %s1341_s18 }
 0x285   : > { %s1641_s12 = sld [smem:[#allocation19_spill]] }
 0x286   : > { %s1642_s19 = sld [smem:[#allocation21_spill]] }
 0x28a   : > { %p25_p12 = scmp.ge.s32.totalorder %s1640_s20, 4  }
 0x28b   : > { %s1644_s18 = smov %s1641_s12 }
 0x28c   :  { %27 = sbr.rel (!%p25_p12) target bundleno = 10 (0xa), region = 130 }
 0x291   :  { %810 = vsyncpa [#allocation3], 1 }
 0x292   :  { %812 = vsyncpa [#allocation3 + $0x1], 1 }
 0x293   :  { %813 = vsyncpa [#allocation6], 1 }
 0x294   :  { %814 = vsyncpa [#allocation9], 1 }
 0x295   :  { %815 = vsyncpa [#allocation12], 1 }
 0x296   :  { %816 = vsyncpa [#allocation4], 1 }
 0x297   :  { %818 = vsyncpa [#allocation4 + $0x1], 1 }

</bundles_post_ra>
